<compile_context>
chip_gen: v6e
topology: v6e:2x2x1
jax: 0.10.0
libtpu: 0.0.40
codegen_flags: <defaults>
</compile_context>

<pallas_src>
import functools
import math

import jax
import jax.numpy as jnp
from jax import lax
from jax.experimental import pallas as pl
from jax.experimental.pallas import tpu as pltpu

# The 4 views the PyTorch module operates on.
VIEWS = ("L_CC", "L_MLO", "R_CC", "R_MLO")

_LANE = 512            # lane-dense last dim (multiple of 128) -> unmasked vst
_MAX_TILE_ROWS = 512   # 512 x 512 x 4B = 1 MiB per tile buffer
_PHI = 0x9E3779B1      # golden-ratio multiplier for the element counter
_SEED_MULT = 0x85EBCA77
_SALTS = (0xA511E9B3, 0xB4B82E39, 0x9E3779B9, 0xC2B2AE3D)


def _u32(v):
    return jnp.uint32(v & 0xFFFFFFFF)


def _avalanche(x):
    """murmur3 fmix32-style avalanche on uint32 lanes (VPU bit ops only)."""
    x = x ^ (x >> 16)
    x = x * _u32(0x85EBCA6B)
    x = x ^ (x >> 13)
    x = x * _u32(0xC2B2AE35)
    x = x ^ (x >> 16)
    return x


def _gaussian_noise_kernel(x_ref, seed_ref, o_ref, *, std, tile_rows, lane):
    """o = x + ~N(0, std^2); noise derived from a hash of the global element index."""
    # Global element index of every lane in this tile: unique across grid tiles and
    # across the 4 fused views -> every element gets an independent noise draw.
    row = lax.broadcasted_iota(jnp.int32, (tile_rows, lane), 0)
    col = lax.broadcasted_iota(jnp.int32, (tile_rows, lane), 1)
    idx = (pl.program_id(0) * tile_rows + row) * lane + col

    seed = seed_ref[0].astype(jnp.uint32) * _u32(_SEED_MULT)
    ctr = idx.astype(jnp.uint32) * _u32(_PHI) + seed

    # Irwin-Hall: sum of 8 sixteen-bit uniforms (2 per hash) ~ N(mean, var) -> standardize.
    acc = jnp.zeros((tile_rows, lane), jnp.float32)
    for salt in _SALTS:
        h = _avalanche(ctr ^ _u32(salt))
        lo = (h & _u32(0xFFFF)).astype(jnp.int32).astype(jnp.float32)
        hi = (h >> 16).astype(jnp.int32).astype(jnp.float32)
        acc = acc + lo + hi
    n_uniform = 2 * len(_SALTS)                       # 8
    # Each term is uniform on {0..65535}: mean 32767.5, std 65536/sqrt(12).
    scale = std / (65536.0 * math.sqrt(n_uniform / 12.0))
    noise = (acc - n_uniform * 32767.5) * scale

    o_ref[...] = (x_ref[...].astype(jnp.float32) + noise).astype(o_ref.dtype)


def _noisy_slab(x2, seed_arr, *, std, tile_rows, lane):
    """One gridded, pipelined, in-place pallas_call over the fused (rows, lane) slab."""
    rows = x2.shape[0]
    grid = (rows // tile_rows,)
    kernel = functools.partial(
        _gaussian_noise_kernel, std=std, tile_rows=tile_rows, lane=lane)
    return pl.pallas_call(
        kernel,
        out_shape=jax.ShapeDtypeStruct(x2.shape, x2.dtype),
        grid=grid,
        in_specs=[
            pl.BlockSpec((tile_rows, lane), lambda i: (i, 0)),       # data tiles
            pl.BlockSpec(memory_space=pltpu.MemorySpace.SMEM),       # seed scalar
        ],
        out_specs=pl.BlockSpec((tile_rows, lane), lambda i: (i, 0)),
        input_output_aliases={0: 0},  # in-place add: input slab aliased to output
        compiler_params=pltpu.CompilerParams(
            dimension_semantics=("parallel",),
            vmem_limit_bytes=32 * 1024 * 1024,
        ),
    )(x2, seed_arr)


def _round_up(x, m):
    return (x + m - 1) // m * m


@functools.partial(jax.jit, static_argnames=("std",))
def _fused_all_views_noise(views, seed, *, std):
    """Single-launch fused path: flatten + concat the 4 views into one lane-dense slab."""
    shapes = [v.shape for v in views]
    dtypes = [v.dtype for v in views]
    sizes = [math.prod(s) for s in shapes]
    total = sum(sizes)

    flat = jnp.concatenate([v.reshape(-1) for v in views])

    rows = _round_up(-(-total // _LANE), 16)
    tile_rows = min(_MAX_TILE_ROWS, rows)
    rows = _round_up(rows, tile_rows)
    padded = rows * _LANE
    if padded > total:
        flat = jnp.pad(flat, (0, padded - total))
    x2 = flat.reshape(rows, _LANE)

    seed_arr = jnp.asarray(seed, jnp.int32).reshape(1)
    y2 = _noisy_slab(x2, seed_arr, std=float(std), tile_rows=tile_rows, lane=_LANE)

    yflat = y2.reshape(-1)
    outs, off = [], 0
    for shp, dt, n in zip(shapes, dtypes, sizes):
        outs.append(yflat[off:off + n].reshape(shp).astype(dt))
        off += n
    return tuple(outs)


def all_views_gaussian_noise(x_dict, *, gaussian_noise_std, training=True, base_seed=0):
    """JAX/Pallas equivalent of AllViewsGaussianNoise.forward.

    x_dict maps each view name in VIEWS to an NCHW array.  In eval mode or with a
    falsy std the inputs are returned unchanged (matching the PyTorch module).
    """
    if not gaussian_noise_std or not training:
        return {v: x_dict[v] for v in VIEWS}
    views = tuple(x_dict[v] for v in VIEWS)
    outs = _fused_all_views_noise(views, jnp.int32(base_seed),
                                  std=float(gaussian_noise_std))
    return dict(zip(VIEWS, outs))


if __name__ == "__main__":
    key = jax.random.PRNGKey(0)
    keys = jax.random.split(key, len(VIEWS))
    shape = (2, 4, 16, 16)  # (N, C, H, W)
    x = {v: jax.random.normal(k, shape, dtype=jnp.float32) for v, k in zip(VIEWS, keys)}

    std = 0.1
    out = all_views_gaussian_noise(x, gaussian_noise_std=std, training=True, base_seed=1234)
    out = jax.tree_util.tree_map(jax.block_until_ready, out)

    ok = True
    diffs = {}
    for v in VIEWS:
        y = out[v]
        ok &= (y.shape == shape) and (y.dtype == x[v].dtype)
        ok &= bool(jnp.all(jnp.isfinite(y)))
        diff = y - x[v]
        diffs[v] = diff
        ok &= bool(jnp.any(jnp.abs(diff) > 0))            # noise actually added
        s = float(jnp.std(diff))
        ok &= (0.5 * std < s < 2.0 * std)                 # ~correct scale
        ok &= abs(float(jnp.mean(diff))) < 0.1 * std      # ~zero mean

    # different views must receive different noise
    ok &= bool(jnp.any(jnp.abs(diffs["L_CC"] - diffs["L_MLO"]) > 0))

    # eval mode / std=0 must be identity
    out_eval = all_views_gaussian_noise(x, gaussian_noise_std=std, training=False)
    for v in VIEWS:
        ok &= bool(jnp.all(out_eval[v] == x[v]))
    out_nostd = all_views_gaussian_noise(x, gaussian_noise_std=0.0, training=True)
    for v in VIEWS:
        ok &= bool(jnp.all(out_nostd[v] == x[v]))

    if ok:
        print("KERNEL_OK")
    else:
        print("KERNEL_FAIL")
</pallas_src>

<mosaic_0001>
module attributes {stable_mosaic.version = 11 : i64} {
  func.func @_gaussian_noise_kernel(%arg0: i32, %arg1: memref<16x512xf32, #tpu.memory_space<vmem>>, %arg2: memref<1xi32, #tpu.memory_space<smem>>, %arg3: memref<16x512xf32, #tpu.memory_space<vmem>>) attributes {dimension_semantics = [#tpu.dimension_semantics<parallel>], iteration_bounds = array<i64: 1>, scalar_prefetch = 0 : i64, scratch_operands = 0 : i64, tpu.core_type = #tpu.core_type<tc>, window_params = [{transform_indices = @transform_0, window_bounds = array<i64: 16, 512>}, {transform_indices = @transform_1, window_bounds = array<i64: 1>}, {transform_indices = @transform_2, window_bounds = array<i64: 16, 512>}]} {
    %0 = tpu.iota {dimensions = array<i32: 0>} : vector<16x512xi32>
    %1 = tpu.iota {dimensions = array<i32: 1>} : vector<16x512xi32>
    %c16_i32 = arith.constant 16 : i32
    %2 = arith.muli %arg0, %c16_i32 : i32
    %3 = vector.broadcast %2 : i32 to vector<16x512xi32>
    %4 = arith.addi %3, %0 : vector<16x512xi32>
    %c512_i32 = arith.constant 512 : i32
    %5 = vector.broadcast %c512_i32 : i32 to vector<16x512xi32>
    %6 = arith.muli %4, %5 : vector<16x512xi32>
    %7 = arith.addi %6, %1 : vector<16x512xi32>
    %c0 = arith.constant 0 : index
    %8 = memref.load %arg2[%c0] : memref<1xi32, #tpu.memory_space<smem>>
    %c-2048144777_i32 = arith.constant -2048144777 : i32
    %9 = arith.muli %8, %c-2048144777_i32 : i32
    %c-1640531535_i32 = arith.constant -1640531535 : i32
    %10 = vector.broadcast %c-1640531535_i32 : i32 to vector<16x512xi32>
    %11 = arith.muli %7, %10 : vector<16x512xi32>
    %12 = vector.broadcast %9 : i32 to vector<16x512xi32>
    %13 = arith.addi %11, %12 : vector<16x512xi32>
    %cst = arith.constant 0.000000e+00 : f32
    %14 = vector.broadcast %cst : f32 to vector<16x512xf32>
    %c-1525552717_i32 = arith.constant -1525552717 : i32
    %15 = vector.broadcast %c-1525552717_i32 : i32 to vector<16x512xi32>
    %16 = arith.xori %13, %15 : vector<16x512xi32>
    %c16_i32_0 = arith.constant 16 : i32
    %17 = vector.broadcast %c16_i32_0 : i32 to vector<16x512xi32>
    %18 = arith.shrui %16, %17 : vector<16x512xi32>
    %19 = arith.xori %16, %18 : vector<16x512xi32>
    %c-2048144789_i32 = arith.constant -2048144789 : i32
    %20 = vector.broadcast %c-2048144789_i32 : i32 to vector<16x512xi32>
    %21 = arith.muli %19, %20 : vector<16x512xi32>
    %c13_i32 = arith.constant 13 : i32
    %22 = vector.broadcast %c13_i32 : i32 to vector<16x512xi32>
    %23 = arith.shrui %21, %22 : vector<16x512xi32>
    %24 = arith.xori %21, %23 : vector<16x512xi32>
    %c-1028477387_i32 = arith.constant -1028477387 : i32
    %25 = vector.broadcast %c-1028477387_i32 : i32 to vector<16x512xi32>
    %26 = arith.muli %24, %25 : vector<16x512xi32>
    %c16_i32_1 = arith.constant 16 : i32
    %27 = vector.broadcast %c16_i32_1 : i32 to vector<16x512xi32>
    %28 = arith.shrui %26, %27 : vector<16x512xi32>
    %29 = arith.xori %26, %28 : vector<16x512xi32>
    %c65535_i32 = arith.constant 65535 : i32
    %30 = vector.broadcast %c65535_i32 : i32 to vector<16x512xi32>
    %31 = arith.andi %29, %30 : vector<16x512xi32>
    %32 = arith.sitofp %31 : vector<16x512xi32> to vector<16x512xf32>
    %c16_i32_2 = arith.constant 16 : i32
    %33 = vector.broadcast %c16_i32_2 : i32 to vector<16x512xi32>
    %34 = arith.shrui %29, %33 : vector<16x512xi32>
    %35 = arith.sitofp %34 : vector<16x512xi32> to vector<16x512xf32>
    %36 = arith.addf %14, %32 : vector<16x512xf32>
    %37 = arith.addf %36, %35 : vector<16x512xf32>
    %c-1262997959_i32 = arith.constant -1262997959 : i32
    %38 = vector.broadcast %c-1262997959_i32 : i32 to vector<16x512xi32>
    %39 = arith.xori %13, %38 : vector<16x512xi32>
    %c16_i32_3 = arith.constant 16 : i32
    %40 = vector.broadcast %c16_i32_3 : i32 to vector<16x512xi32>
    %41 = arith.shrui %39, %40 : vector<16x512xi32>
    %42 = arith.xori %39, %41 : vector<16x512xi32>
    %c-2048144789_i32_4 = arith.constant -2048144789 : i32
    %43 = vector.broadcast %c-2048144789_i32_4 : i32 to vector<16x512xi32>
    %44 = arith.muli %42, %43 : vector<16x512xi32>
    %c13_i32_5 = arith.constant 13 : i32
    %45 = vector.broadcast %c13_i32_5 : i32 to vector<16x512xi32>
    %46 = arith.shrui %44, %45 : vector<16x512xi32>
    %47 = arith.xori %44, %46 : vector<16x512xi32>
    %c-1028477387_i32_6 = arith.constant -1028477387 : i32
    %48 = vector.broadcast %c-1028477387_i32_6 : i32 to vector<16x512xi32>
    %49 = arith.muli %47, %48 : vector<16x512xi32>
    %c16_i32_7 = arith.constant 16 : i32
    %50 = vector.broadcast %c16_i32_7 : i32 to vector<16x512xi32>
    %51 = arith.shrui %49, %50 : vector<16x512xi32>
    %52 = arith.xori %49, %51 : vector<16x512xi32>
    %c65535_i32_8 = arith.constant 65535 : i32
    %53 = vector.broadcast %c65535_i32_8 : i32 to vector<16x512xi32>
    %54 = arith.andi %52, %53 : vector<16x512xi32>
    %55 = arith.sitofp %54 : vector<16x512xi32> to vector<16x512xf32>
    %c16_i32_9 = arith.constant 16 : i32
    %56 = vector.broadcast %c16_i32_9 : i32 to vector<16x512xi32>
    %57 = arith.shrui %52, %56 : vector<16x512xi32>
    %58 = arith.sitofp %57 : vector<16x512xi32> to vector<16x512xf32>
    %59 = arith.addf %37, %55 : vector<16x512xf32>
    %60 = arith.addf %59, %58 : vector<16x512xf32>
    %c-1640531527_i32 = arith.constant -1640531527 : i32
    %61 = vector.broadcast %c-1640531527_i32 : i32 to vector<16x512xi32>
    %62 = arith.xori %13, %61 : vector<16x512xi32>
    %c16_i32_10 = arith.constant 16 : i32
    %63 = vector.broadcast %c16_i32_10 : i32 to vector<16x512xi32>
    %64 = arith.shrui %62, %63 : vector<16x512xi32>
    %65 = arith.xori %62, %64 : vector<16x512xi32>
    %c-2048144789_i32_11 = arith.constant -2048144789 : i32
    %66 = vector.broadcast %c-2048144789_i32_11 : i32 to vector<16x512xi32>
    %67 = arith.muli %65, %66 : vector<16x512xi32>
    %c13_i32_12 = arith.constant 13 : i32
    %68 = vector.broadcast %c13_i32_12 : i32 to vector<16x512xi32>
    %69 = arith.shrui %67, %68 : vector<16x512xi32>
    %70 = arith.xori %67, %69 : vector<16x512xi32>
    %c-1028477387_i32_13 = arith.constant -1028477387 : i32
    %71 = vector.broadcast %c-1028477387_i32_13 : i32 to vector<16x512xi32>
    %72 = arith.muli %70, %71 : vector<16x512xi32>
    %c16_i32_14 = arith.constant 16 : i32
    %73 = vector.broadcast %c16_i32_14 : i32 to vector<16x512xi32>
    %74 = arith.shrui %72, %73 : vector<16x512xi32>
    %75 = arith.xori %72, %74 : vector<16x512xi32>
    %c65535_i32_15 = arith.constant 65535 : i32
    %76 = vector.broadcast %c65535_i32_15 : i32 to vector<16x512xi32>
    %77 = arith.andi %75, %76 : vector<16x512xi32>
    %78 = arith.sitofp %77 : vector<16x512xi32> to vector<16x512xf32>
    %c16_i32_16 = arith.constant 16 : i32
    %79 = vector.broadcast %c16_i32_16 : i32 to vector<16x512xi32>
    %80 = arith.shrui %75, %79 : vector<16x512xi32>
    %81 = arith.sitofp %80 : vector<16x512xi32> to vector<16x512xf32>
    %82 = arith.addf %60, %78 : vector<16x512xf32>
    %83 = arith.addf %82, %81 : vector<16x512xf32>
    %c-1028477379_i32 = arith.constant -1028477379 : i32
    %84 = vector.broadcast %c-1028477379_i32 : i32 to vector<16x512xi32>
    %85 = arith.xori %13, %84 : vector<16x512xi32>
    %c16_i32_17 = arith.constant 16 : i32
    %86 = vector.broadcast %c16_i32_17 : i32 to vector<16x512xi32>
    %87 = arith.shrui %85, %86 : vector<16x512xi32>
    %88 = arith.xori %85, %87 : vector<16x512xi32>
    %c-2048144789_i32_18 = arith.constant -2048144789 : i32
    %89 = vector.broadcast %c-2048144789_i32_18 : i32 to vector<16x512xi32>
    %90 = arith.muli %88, %89 : vector<16x512xi32>
    %c13_i32_19 = arith.constant 13 : i32
    %91 = vector.broadcast %c13_i32_19 : i32 to vector<16x512xi32>
    %92 = arith.shrui %90, %91 : vector<16x512xi32>
    %93 = arith.xori %90, %92 : vector<16x512xi32>
    %c-1028477387_i32_20 = arith.constant -1028477387 : i32
    %94 = vector.broadcast %c-1028477387_i32_20 : i32 to vector<16x512xi32>
    %95 = arith.muli %93, %94 : vector<16x512xi32>
    %c16_i32_21 = arith.constant 16 : i32
    %96 = vector.broadcast %c16_i32_21 : i32 to vector<16x512xi32>
    %97 = arith.shrui %95, %96 : vector<16x512xi32>
    %98 = arith.xori %95, %97 : vector<16x512xi32>
    %c65535_i32_22 = arith.constant 65535 : i32
    %99 = vector.broadcast %c65535_i32_22 : i32 to vector<16x512xi32>
    %100 = arith.andi %98, %99 : vector<16x512xi32>
    %101 = arith.sitofp %100 : vector<16x512xi32> to vector<16x512xf32>
    %c16_i32_23 = arith.constant 16 : i32
    %102 = vector.broadcast %c16_i32_23 : i32 to vector<16x512xi32>
    %103 = arith.shrui %98, %102 : vector<16x512xi32>
    %104 = arith.sitofp %103 : vector<16x512xi32> to vector<16x512xf32>
    %105 = arith.addf %83, %101 : vector<16x512xf32>
    %106 = arith.addf %105, %104 : vector<16x512xf32>
    %cst_24 = arith.constant 2.621400e+05 : f32
    %107 = vector.broadcast %cst_24 : f32 to vector<16x512xf32>
    %108 = arith.subf %106, %107 : vector<16x512xf32>
    %cst_25 = arith.constant 1.86881232E-6 : f32
    %109 = vector.broadcast %cst_25 : f32 to vector<16x512xf32>
    %110 = arith.mulf %108, %109 : vector<16x512xf32>
    %c0_26 = arith.constant 0 : index
    %c0_27 = arith.constant 0 : index
    %111 = vector.load %arg1[%c0_26, %c0_27] : memref<16x512xf32, #tpu.memory_space<vmem>>, vector<16x512xf32>
    %112 = arith.addf %111, %110 : vector<16x512xf32>
    %c0_28 = arith.constant 0 : index
    %c0_29 = arith.constant 0 : index
    %113 = vector.load %arg3[%c0_28, %c0_29] : memref<16x512xf32, #tpu.memory_space<vmem>>, vector<16x512xf32>
    tpu.vector_store %arg3[%c0_28, %c0_29], %112 {strides = array<i32>} : memref<16x512xf32, #tpu.memory_space<vmem>>, vector<16x512xf32>,
    return
  }
  func.func @transform_0(%arg0: i32) -> (i32, i32) {
    %c0_i32 = arith.constant 0 : i32
    %c0_i32_0 = arith.constant 0 : i32
    return %arg0, %c0_i32 : i32, i32
  }
  func.func @transform_1(%arg0: i32) -> i32 {
    %c0_i32 = arith.constant 0 : i32
    %c0_i32_0 = arith.constant 0 : i32
    return %c0_i32 : i32
  }
  func.func @transform_2(%arg0: i32) -> (i32, i32) {
    %c0_i32 = arith.constant 0 : i32
    %c0_i32_0 = arith.constant 0 : i32
    return %arg0, %c0_i32 : i32, i32
  }
}

</mosaic_0001>

<bundles_post_ra>
// kernel: _fused_all_views_noise.1
= control target key start
LH: loop header
LB: loop body
LE: loop exit
PB: predicated region body
PF: predicated region fallthrough
CT: control target
= control target key end

     0   :  { %v12_v0 = vlaneseq  ;;  %s801_s1 = inlined_call_operand.<no memory space> [shape: s32[1], index: 1, kind: input, shape index: {}]   ;;  %s802_s0 = inlined_call_operand.vmem [shape: f32[16,512], index: 0, kind: input, shape index: {}, may-alias: {0,2}]   ;;  %s803_s2 = inlined_call_operand.vmem [shape: f32[16,512], index: 2, kind: output, shape index: {}, may-alias: {0,2}]  }
   0x1   :  { %s35_s11 = smul.u32 2246822519, %s801_s1 }
   0x2   :  { %v13_v1 = vshrl.u32 %v12_v0, 7  ;;  %v16_v2 = vand.u32 127, %v12_v0 }
   0x3   :  { %v44_v9 = vstv %s35_s11 }
   0x4   :  { %v14_v3 = vadd.s32 8, %v13_v1  ;;  %v17_v4 = vadd.s32 128, %v16_v2  ;;  %v18_v5 = vadd.s32 256, %v16_v2  ;;  %v19_v6 = vadd.s32 384, %v16_v2 }
   0x5   :  { %v24_v7 = vmul.u32 512, %v13_v1 }
   0x6   :  { %v25_v8 = vmul.u32 512, %v14_v3 }
   0x7   :  { %v26_v10 = vadd.s32 %v24_v7, %v16_v2  ;;  %v27_v11 = vadd.s32 %v24_v7, %v17_v4  ;;  %v28_v12 = vadd.s32 %v24_v7, %v18_v5  ;;  %v29_v13 = vadd.s32 %v24_v7, %v19_v6 }
   0x8   :  { %v30_v14 = vadd.s32 %v25_v8, %v16_v2  ;;  %v31_v15 = vadd.s32 %v25_v8, %v17_v4  ;;  %v32_v16 = vadd.s32 %v25_v8, %v18_v5  ;;  %v33_v17 = vadd.s32 %v25_v8, %v19_v6 }
   0x9   :  { %v36_v18 = vmul.u32 2654435761, %v26_v10  ;;  %v37_v19 = vmul.u32 2654435761, %v27_v11 }
   0xa   :  { %v38_v20 = vmul.u32 2654435761, %v28_v12  ;;  %v39_v21 = vmul.u32 2654435761, %v29_v13 }
   0xb   :  { %v40_v22 = vmul.u32 2654435761, %v30_v14  ;;  %v41_v23 = vmul.u32 2654435761, %v31_v15  ;;  %v603_v24 = vadd.s32 %v44_v9, %v36_v18  ;;  %v605_v25 = vadd.s32 %v44_v9, %v37_v19 }
   0xc   :  { %v42_v26 = vmul.u32 2654435761, %v32_v16  ;;  %v43_v27 = vmul.u32 2654435761, %v33_v17  ;;  %v607_v28 = vadd.s32 %v44_v9, %v38_v20  ;;  %v609_v29 = vadd.s32 %v44_v9, %v39_v21 }
   0xd   :  { %v611_v30 = vadd.s32 %v44_v9, %v40_v22  ;;  %v613_v31 = vadd.s32 %v44_v9, %v41_v23  ;;  %v53_v32 = vxor.u32 2769414579, %v603_v24  ;;  %v54_v33 = vxor.u32 2769414579, %v605_v25 }
   0xe   :  { %v617_v34 = vadd.s32 %v44_v9, %v42_v26  ;;  %v619_v35 = vadd.s32 %v44_v9, %v43_v27  ;;  %v55_v36 = vxor.u32 2769414579, %v607_v28  ;;  %v56_v37 = vxor.u32 2769414579, %v609_v29 }
   0xf   :  { %v57_v38 = vxor.u32 2769414579, %v611_v30  ;;  %v58_v39 = vxor.u32 2769414579, %v613_v31  ;;  %v61_v40 = vshrl.u32 %v53_v32, 16  ;;  %v62_v41 = vshrl.u32 %v54_v33, 16 }
  0x10   :  { %v59_v42 = vxor.u32 2769414579, %v617_v34  ;;  %v60_v43 = vxor.u32 2769414579, %v619_v35  ;;  %v63_v44 = vshrl.u32 %v55_v36, 16  ;;  %v64_v45 = vshrl.u32 %v56_v37, 16 }
  0x11   :  { %v65_v46 = vshrl.u32 %v57_v38, 16  ;;  %v66_v47 = vshrl.u32 %v58_v39, 16  ;;  %v69_v48 = vxor.u32 %v61_v40, %v53_v32  ;;  %v70_v49 = vxor.u32 %v62_v41, %v54_v33 }
  0x12   :  { %v67_v50 = vshrl.u32 %v59_v42, 16  ;;  %v68_v51 = vshrl.u32 %v60_v43, 16  ;;  %v71_v52 = vxor.u32 %v63_v44, %v55_v36  ;;  %v72_v53 = vxor.u32 %v64_v45, %v56_v37 }
  0x13   :  { %v73_v54 = vxor.u32 %v65_v46, %v57_v38  ;;  %v74_v55 = vxor.u32 %v66_v47, %v58_v39  ;;  %v77_v56 = vmul.u32 2246822507, %v69_v48  ;;  %v78_v57 = vmul.u32 2246822507, %v70_v49 }
  0x14   :  { %v75_v58 = vxor.u32 %v67_v50, %v59_v42  ;;  %v76_v59 = vxor.u32 %v68_v51, %v60_v43  ;;  %v79_v60 = vmul.u32 2246822507, %v71_v52  ;;  %v80_v61 = vmul.u32 2246822507, %v72_v53 }
  0x15   :  { %v81_v62 = vmul.u32 2246822507, %v73_v54  ;;  %v82_v63 = vmul.u32 2246822507, %v74_v55  ;;  %v85_v0 = vshrl.u32 %v77_v56, 13  ;;  %v86_v1 = vshrl.u32 %v78_v57, 13 }
  0x16   :  { %v83_v2 = vmul.u32 2246822507, %v75_v58  ;;  %v84_v3 = vmul.u32 2246822507, %v76_v59  ;;  %v87_v4 = vshrl.u32 %v79_v60, 13  ;;  %v88_v5 = vshrl.u32 %v80_v61, 13 }
  0x17   :  { %v89_v6 = vshrl.u32 %v81_v62, 13  ;;  %v90_v7 = vshrl.u32 %v82_v63, 13  ;;  %v93_v8 = vxor.u32 %v85_v0, %v77_v56  ;;  %v94_v9 = vxor.u32 %v86_v1, %v78_v57 }
  0x18   :  { %v91_v10 = vshrl.u32 %v83_v2, 13  ;;  %v92_v11 = vshrl.u32 %v84_v3, 13  ;;  %v95_v12 = vxor.u32 %v87_v4, %v79_v60  ;;  %v96_v13 = vxor.u32 %v88_v5, %v80_v61 }
  0x19   :  { %v97_v14 = vxor.u32 %v89_v6, %v81_v62  ;;  %v98_v15 = vxor.u32 %v90_v7, %v82_v63  ;;  %v101_v16 = vmul.u32 3266489909, %v93_v8  ;;  %v102_v17 = vmul.u32 3266489909, %v94_v9 }
  0x1a   :  { %v99_v18 = vxor.u32 %v91_v10, %v83_v2  ;;  %v100_v19 = vxor.u32 %v92_v11, %v84_v3  ;;  %v103_v20 = vmul.u32 3266489909, %v95_v12  ;;  %v104_v21 = vmul.u32 3266489909, %v96_v13 }
  0x1b   :  { %v105_v22 = vmul.u32 3266489909, %v97_v14  ;;  %v106_v23 = vmul.u32 3266489909, %v98_v15  ;;  %v109_v26 = vshrl.u32 %v101_v16, 16  ;;  %v110_v27 = vshrl.u32 %v102_v17, 16 }
  0x1c   :  { %v107_v32 = vmul.u32 3266489909, %v99_v18  ;;  %v108_v33 = vmul.u32 3266489909, %v100_v19  ;;  %v111_v36 = vshrl.u32 %v103_v20, 16  ;;  %v112_v37 = vshrl.u32 %v104_v21, 16 }
  0x1d   :  { %v113_v38 = vshrl.u32 %v105_v22, 16  ;;  %v114_v39 = vshrl.u32 %v106_v23, 16  ;;  %v117_v40 = vxor.u32 %v109_v26, %v101_v16  ;;  %v118_v43 = vxor.u32 %v110_v27, %v102_v17 }
  0x1e   :  { %v115_v41 = vshrl.u32 %v107_v32, 16  ;;  %v116_v42 = vshrl.u32 %v108_v33, 16  ;;  %v119_v44 = vxor.u32 %v111_v36, %v103_v20  ;;  %v120_v45 = vxor.u32 %v112_v37, %v104_v21 }
  0x1f   :  { %v121_v46 = vxor.u32 %v113_v38, %v105_v22  ;;  %v122_v47 = vxor.u32 %v114_v39, %v106_v23  ;;  %v125_v50 = vand.u32 65535, %v117_v40  ;;  %v126_v51 = vand.u32 65535, %v118_v43 }
  0x20   :  { %v123_v48 = vxor.u32 %v115_v41, %v107_v32  ;;  %v124_v49 = vxor.u32 %v116_v42, %v108_v33  ;;  %v127_v52 = vand.u32 65535, %v119_v44  ;;  %v128_v53 = vand.u32 65535, %v120_v45 }
  0x21   :  { %v129_v54 = vand.u32 65535, %v121_v46  ;;  %v130_v55 = vand.u32 65535, %v122_v47  ;;  %v141_v58 = vshrl.u32 %v117_v40, 16  ;;  %v142_v59 = vshrl.u32 %v118_v43, 16 }
  0x22   :  { %v131_v56 = vand.u32 65535, %v123_v48  ;;  %v132_v57 = vand.u32 65535, %v124_v49  ;;  %v143_v60 = vshrl.u32 %v119_v44, 16  ;;  %v144_v61 = vshrl.u32 %v120_v45, 16 }
  0x23   :  { %v627_v62 = vcvt.s32.f32 %v125_v50  ;;  %v629_v63 = vcvt.s32.f32 %v126_v51  ;;  %v631_v0 = vcvt.s32.f32 %v127_v52  ;;  %v145_v1 = vshrl.u32 %v121_v46, 16 }
  0x24   :  { %v633_v2 = vcvt.s32.f32 %v128_v53  ;;  %v635_v3 = vcvt.s32.f32 %v129_v54  ;;  %v637_v4 = vcvt.s32.f32 %v130_v55  ;;  %v146_v5 = vshrl.u32 %v122_v47, 16 }
  0x25   :  { %v639_v6 = vcvt.s32.f32 %v131_v56  ;;  %v641_v7 = vcvt.s32.f32 %v132_v57  ;;  %v147_v8 = vshrl.u32 %v123_v48, 16  ;;  %v148_v9 = vshrl.u32 %v124_v49, 16 }
  0x26   :  { %v643_v10 = vcvt.s32.f32 %v141_v58  ;;  %v645_v11 = vcvt.s32.f32 %v142_v59  ;;  %v647_v12 = vcvt.s32.f32 %v143_v60  ;;  %v649_v13 = vcvt.s32.f32 %v144_v61 }
  0x27   :  { %v651_v14 = vcvt.s32.f32 %v145_v1  ;;  %v173_v15 = vxor.u32 3031969337, %v603_v24  ;;  %v174_v16 = vxor.u32 3031969337, %v605_v25  ;;  %v175_v17 = vxor.u32 3031969337, %v607_v28 }
  0x28   :  { %v656_v18 = vcvt.s32.f32 %v146_v5  ;;  %v176_v19 = vxor.u32 3031969337, %v609_v29  ;;  %v177_v20 = vxor.u32 3031969337, %v611_v30  ;;  %v178_v21 = vxor.u32 3031969337, %v613_v31 }
  0x29   :  { %v179_v22 = vxor.u32 3031969337, %v617_v34  ;;  %v180_v23 = vxor.u32 3031969337, %v619_v35  ;;  %v181_v26 = vshrl.u32 %v173_v15, 16  ;;  %v182_v27 = vshrl.u32 %v174_v16, 16 }
  0x2a   :  { %v183_v32 = vshrl.u32 %v175_v17, 16  ;;  %v184_v33 = vshrl.u32 %v176_v19, 16  ;;  %v185_v36 = vshrl.u32 %v177_v20, 16  ;;  %v186_v37 = vshrl.u32 %v178_v21, 16 }
  0x2b   :  { %v187_v38 = vshrl.u32 %v179_v22, 16  ;;  %v188_v39 = vshrl.u32 %v180_v23, 16  ;;  %v189_v40 = vxor.u32 %v181_v26, %v173_v15  ;;  %v190_v41 = vxor.u32 %v182_v27, %v174_v16 }
  0x2c   :  { %v191_v42 = vxor.u32 %v183_v32, %v175_v17  ;;  %v192_v43 = vxor.u32 %v184_v33, %v176_v19  ;;  %v193_v44 = vxor.u32 %v185_v36, %v177_v20  ;;  %v194_v45 = vxor.u32 %v186_v37, %v178_v21 }
  0x2d   :  { %v195_v46 = vxor.u32 %v187_v38, %v179_v22  ;;  %v196_v47 = vxor.u32 %v188_v39, %v180_v23  ;;  %v197_v48 = vmul.u32 2246822507, %v189_v40  ;;  %v198_v49 = vmul.u32 2246822507, %v190_v41 }
  0x2e   :  { %v155_v50 = vcvt.s32.f32 %v147_v8  ;;  %v156_v51 = vcvt.s32.f32 %v148_v9  ;;  %v199_v52 = vmul.u32 2246822507, %v191_v42  ;;  %v200_v53 = vmul.u32 2246822507, %v192_v43 }
  0x2f   :  { %v201_v54 = vmul.u32 2246822507, %v193_v44  ;;  %v202_v55 = vmul.u32 2246822507, %v194_v45  ;;  %v205_v56 = vshrl.u32 %v197_v48, 13  ;;  %v206_v57 = vshrl.u32 %v198_v49, 13 }
  0x30   :  { %v203_v58 = vmul.u32 2246822507, %v195_v46  ;;  %v204_v59 = vmul.u32 2246822507, %v196_v47  ;;  %v207_v60 = vshrl.u32 %v199_v52, 13  ;;  %v208_v61 = vshrl.u32 %v200_v53, 13 }
  0x31   :  { %v209_v1 = vshrl.u32 %v201_v54, 13  ;;  %v210_v5 = vshrl.u32 %v202_v55, 13  ;;  %v213_v15 = vxor.u32 %v205_v56, %v197_v48  ;;  %v214_v16 = vxor.u32 %v206_v57, %v198_v49 }
  0x32   :  { %v211_v17 = vshrl.u32 %v203_v58, 13  ;;  %v212_v19 = vshrl.u32 %v204_v59, 13  ;;  %v215_v20 = vxor.u32 %v207_v60, %v199_v52  ;;  %v216_v21 = vxor.u32 %v208_v61, %v200_v53 }
  0x33   :  { %v217_v8 = vxor.u32 %v209_v1, %v201_v54  ;;  %v218_v9 = vxor.u32 %v210_v5, %v202_v55  ;;  %v221_v22 = vmul.u32 3266489909, %v213_v15  ;;  %v222_v23 = vmul.u32 3266489909, %v214_v16 }
  0x34   :  { %v219_v26 = vxor.u32 %v211_v17, %v203_v58  ;;  %v220_v27 = vxor.u32 %v212_v19, %v204_v59  ;;  %v223_v32 = vmul.u32 3266489909, %v215_v20  ;;  %v224_v33 = vmul.u32 3266489909, %v216_v21 }
  0x35   :  { %v225_v36 = vmul.u32 3266489909, %v217_v8  ;;  %v226_v37 = vmul.u32 3266489909, %v218_v9  ;;  %v229_v38 = vshrl.u32 %v221_v22, 16  ;;  %v230_v39 = vshrl.u32 %v222_v23, 16 }
  0x36   :  { %v227_v40 = vmul.u32 3266489909, %v219_v26  ;;  %v228_v41 = vmul.u32 3266489909, %v220_v27  ;;  %v231_v42 = vshrl.u32 %v223_v32, 16  ;;  %v232_v43 = vshrl.u32 %v224_v33, 16 }
  0x37   :  { %v165_v44 = vadd.f32 %v643_v10, %v627_v62  ;;  %v233_v45 = vshrl.u32 %v225_v36, 16  ;;  %v234_v46 = vshrl.u32 %v226_v37, 16  ;;  %v237_v47 = vxor.u32 %v229_v38, %v221_v22 }
  0x38   :  { %v235_v48 = vshrl.u32 %v227_v40, 16  ;;  %v236_v49 = vshrl.u32 %v228_v41, 16  ;;  %v238_v52 = vxor.u32 %v230_v39, %v222_v23  ;;  %v239_v53 = vxor.u32 %v231_v42, %v223_v32 }
  0x39   :  { %v166_v54 = vadd.f32 %v645_v11, %v629_v63  ;;  %v240_v55 = vxor.u32 %v232_v43, %v224_v33  ;;  %v241_v56 = vxor.u32 %v233_v45, %v225_v36  ;;  %v242_v57 = vxor.u32 %v234_v46, %v226_v37 }
  0x3a   :  { %v167_v58 = vadd.f32 %v647_v12, %v631_v0  ;;  %v168_v59 = vadd.f32 %v649_v13, %v633_v2  ;;  %v243_v62 = vxor.u32 %v235_v48, %v227_v40  ;;  %v244_v10 = vxor.u32 %v236_v49, %v228_v41 }
  0x3b   :  { %v169_v60 = vadd.f32 %v651_v14, %v635_v3  ;;  %v170_v61 = vadd.f32 %v656_v18, %v637_v4  ;;  %v171_v1 = vadd.f32 %v155_v50, %v639_v6  ;;  %v245_v63 = vand.u32 65535, %v237_v47 }
  0x3c   :  { %v172_v11 = vadd.f32 %v156_v51, %v641_v7  ;;  %v246_v5 = vand.u32 65535, %v238_v52  ;;  %v247_v15 = vand.u32 65535, %v239_v53  ;;  %v293_v0 = vxor.u32 2654435769, %v603_v24 }
  0x3d   :  { %v248_v12 = vand.u32 65535, %v240_v55  ;;  %v249_v16 = vand.u32 65535, %v241_v56  ;;  %v250_v2 = vand.u32 65535, %v242_v57  ;;  %v251_v13 = vand.u32 65535, %v243_v62 }
  0x3e   :  { %v252_v17 = vand.u32 65535, %v244_v10  ;;  %v261_v19 = vshrl.u32 %v237_v47, 16  ;;  %v262_v20 = vshrl.u32 %v238_v52, 16  ;;  %v263_v3 = vshrl.u32 %v239_v53, 16 }
  0x3f   :  { %v253_v14 = vcvt.s32.f32 %v245_v63  ;;  %v264_v21 = vshrl.u32 %v240_v55, 16  ;;  %v265_v4 = vshrl.u32 %v241_v56, 16  ;;  %v266_v18 = vshrl.u32 %v242_v57, 16 }
  0x40   :  { %v254_v6 = vcvt.s32.f32 %v246_v5  ;;  %v255_v50 = vcvt.s32.f32 %v247_v15  ;;  %v267_v8 = vshrl.u32 %v243_v62, 16  ;;  %v268_v7 = vshrl.u32 %v244_v10, 16 }
  0x41   :  { %v256_v51 = vcvt.s32.f32 %v248_v12  ;;  %v257_v9 = vcvt.s32.f32 %v249_v16  ;;  %v258_v22 = vcvt.s32.f32 %v250_v2  ;;  %v259_v23 = vcvt.s32.f32 %v251_v13 }
  0x42   :  { %v260_v26 = vcvt.s32.f32 %v252_v17  ;;  %v269_v27 = vcvt.s32.f32 %v261_v19  ;;  %v270_v32 = vcvt.s32.f32 %v262_v20  ;;  %v271_v33 = vcvt.s32.f32 %v263_v3 }
  0x43   :  { %v272_v36 = vcvt.s32.f32 %v264_v21  ;;  %v678_v37 = vcvt.s32.f32 %v265_v4  ;;  %v680_v38 = vcvt.s32.f32 %v266_v18  ;;  %v277_v39 = vadd.f32 %v253_v14, %v165_v44 }
  0x44   :  { %v682_v40 = vcvt.s32.f32 %v267_v8  ;;  %v684_v41 = vcvt.s32.f32 %v268_v7  ;;  %v278_v42 = vadd.f32 %v254_v6, %v166_v54  ;;  %v279_v43 = vadd.f32 %v255_v50, %v167_v58 }
  0x45   :  { %v280_v45 = vadd.f32 %v256_v51, %v168_v59  ;;  %v686_v46 = vadd.f32 %v257_v9, %v169_v60  ;;  %v688_v47 = vadd.f32 %v258_v22, %v170_v61  ;;  %v690_v48 = vadd.f32 %v259_v23, %v171_v1 }
  0x46   :  { %v692_v49 = vadd.f32 %v260_v26, %v172_v11  ;;  %v294_v52 = vxor.u32 2654435769, %v605_v25  ;;  %v295_v53 = vxor.u32 2654435769, %v607_v28  ;;  %v296_v44 = vxor.u32 2654435769, %v609_v29 }
  0x47   :  { %v697_v55 = vadd.f32 %v277_v39, %v269_v27  ;;  %v297_v54 = vxor.u32 2654435769, %v611_v30  ;;  %v298_v56 = vxor.u32 2654435769, %v613_v31  ;;  %v299_v57 = vxor.u32 2654435769, %v617_v34 }
  0x48   :  { %v300_v58 = vxor.u32 2654435769, %v619_v35  ;;  %v301_v59 = vshrl.u32 %v293_v0, 16  ;;  %v302_v62 = vshrl.u32 %v294_v52, 16  ;;  %v303_v10 = vshrl.u32 %v295_v53, 16 }
  0x49   :  { %v304_v60 = vshrl.u32 %v296_v44, 16  ;;  %v305_v61 = vshrl.u32 %v297_v54, 16  ;;  %v306_v1 = vshrl.u32 %v298_v56, 16  ;;  %v307_v63 = vshrl.u32 %v299_v57, 16 }
  0x4a   :  { %v308_v11 = vshrl.u32 %v300_v58, 16  ;;  %v309_v5 = vxor.u32 %v301_v59, %v293_v0  ;;  %v310_v15 = vxor.u32 %v302_v62, %v294_v52  ;;  %v311_v12 = vxor.u32 %v303_v10, %v295_v53 }
  0x4b   :  { %v312_v16 = vxor.u32 %v304_v60, %v296_v44  ;;  %v313_v2 = vxor.u32 %v305_v61, %v297_v54  ;;  %v314_v13 = vxor.u32 %v306_v1, %v298_v56  ;;  %v315_v17 = vxor.u32 %v307_v63, %v299_v57 }
  0x4c   :  { %v703_v19 = vadd.f32 %v278_v42, %v270_v32  ;;  %v316_v20 = vxor.u32 %v308_v11, %v300_v58  ;;  %v317_v3 = vmul.u32 2246822507, %v309_v5  ;;  %v318_v14 = vmul.u32 2246822507, %v310_v15 }
  0x4d   :  { %v705_v21 = vadd.f32 %v279_v43, %v271_v33  ;;  %v707_v4 = vadd.f32 %v280_v45, %v272_v36  ;;  %v319_v18 = vmul.u32 2246822507, %v311_v12  ;;  %v320_v6 = vmul.u32 2246822507, %v312_v16 }
  0x4e   :  { %v321_v50 = vmul.u32 2246822507, %v313_v2  ;;  %v322_v8 = vmul.u32 2246822507, %v314_v13  ;;  %v325_v0 = vshrl.u32 %v317_v3, 13  ;;  %v326_v7 = vshrl.u32 %v318_v14, 13 }
  0x4f   :  { %v323_v51 = vmul.u32 2246822507, %v315_v17  ;;  %v324_v9 = vmul.u32 2246822507, %v316_v20  ;;  %v327_v22 = vshrl.u32 %v319_v18, 13  ;;  %v328_v23 = vshrl.u32 %v320_v6, 13 }
  0x50   :  { %v329_v26 = vshrl.u32 %v321_v50, 13  ;;  %v330_v27 = vshrl.u32 %v322_v8, 13  ;;  %v333_v32 = vxor.u32 %v325_v0, %v317_v3  ;;  %v334_v39 = vxor.u32 %v326_v7, %v318_v14 }
  0x51   :  { %v331_v42 = vshrl.u32 %v323_v51, 13  ;;  %v332_v52 = vshrl.u32 %v324_v9, 13  ;;  %v335_v33 = vxor.u32 %v327_v22, %v319_v18  ;;  %v336_v43 = vxor.u32 %v328_v23, %v320_v6 }
  0x52   :  { %v337_v36 = vxor.u32 %v329_v26, %v321_v50  ;;  %v338_v45 = vxor.u32 %v330_v27, %v322_v8  ;;  %v341_v53 = vmul.u32 3266489909, %v333_v32  ;;  %v342_v44 = vmul.u32 3266489909, %v334_v39 }
  0x53   :  { %v339_v54 = vxor.u32 %v331_v42, %v323_v51  ;;  %v340_v56 = vxor.u32 %v332_v52, %v324_v9  ;;  %v343_v57 = vmul.u32 3266489909, %v335_v33  ;;  %v344_v58 = vmul.u32 3266489909, %v336_v43 }
  0x54   :  { %v345_v59 = vmul.u32 3266489909, %v337_v36  ;;  %v346_v62 = vmul.u32 3266489909, %v338_v45  ;;  %v349_v10 = vshrl.u32 %v341_v53, 16  ;;  %v350_v60 = vshrl.u32 %v342_v44, 16 }
  0x55   :  { %v347_v61 = vmul.u32 3266489909, %v339_v54  ;;  %v348_v1 = vmul.u32 3266489909, %v340_v56  ;;  %v351_v63 = vshrl.u32 %v343_v57, 16  ;;  %v352_v11 = vshrl.u32 %v344_v58, 16 }
  0x56   :  { %v353_v5 = vshrl.u32 %v345_v59, 16  ;;  %v354_v15 = vshrl.u32 %v346_v62, 16  ;;  %v357_v12 = vxor.u32 %v349_v10, %v341_v53  ;;  %v358_v16 = vxor.u32 %v350_v60, %v342_v44 }
  0x57   :  { %v355_v2 = vshrl.u32 %v347_v61, 16  ;;  %v356_v13 = vshrl.u32 %v348_v1, 16  ;;  %v359_v17 = vxor.u32 %v351_v63, %v343_v57  ;;  %v360_v20 = vxor.u32 %v352_v11, %v344_v58 }
  0x58   :  { %v289_v3 = vadd.f32 %v686_v46, %v678_v37  ;;  %v361_v14 = vxor.u32 %v353_v5, %v345_v59  ;;  %v362_v18 = vxor.u32 %v354_v15, %v346_v62  ;;  %v365_v6 = vand.u32 65535, %v357_v12 }
  0x59   :  { %v363_v50 = vxor.u32 %v355_v2, %v347_v61  ;;  %v364_v8 = vxor.u32 %v356_v13, %v348_v1  ;;  %v366_v0 = vand.u32 65535, %v358_v16  ;;  %v367_v7 = vand.u32 65535, %v359_v17 }
  0x5a   :  { %v290_v51 = vadd.f32 %v688_v47, %v680_v38  ;;  %v291_v9 = vadd.f32 %v690_v48, %v682_v40  ;;  %v292_v22 = vadd.f32 %v692_v49, %v684_v41  ;;  %v368_v23 = vand.u32 65535, %v360_v20 }
  0x5b   :  { %v369_v26 = vand.u32 65535, %v361_v14  ;;  %v370_v27 = vand.u32 65535, %v362_v18  ;;  %v413_v37 = vxor.u32 3266489917, %v603_v24  ;;  %v414_v46 = vxor.u32 3266489917, %v605_v25 }
  0x5c   :  { %v371_v32 = vand.u32 65535, %v363_v50  ;;  %v372_v39 = vand.u32 65535, %v364_v8  ;;  %v381_v42 = vshrl.u32 %v357_v12, 16  ;;  %v382_v52 = vshrl.u32 %v358_v16, 16 }
  0x5d   :  { %v373_v33 = vcvt.s32.f32 %v365_v6  ;;  %v374_v43 = vcvt.s32.f32 %v366_v0  ;;  %v375_v38 = vcvt.s32.f32 %v367_v7  ;;  %v383_v47 = vshrl.u32 %v359_v17, 16 }
  0x5e   :  { %v376_v36 = vcvt.s32.f32 %v368_v23  ;;  %v384_v40 = vshrl.u32 %v360_v20, 16  ;;  %v385_v48 = vshrl.u32 %v361_v14, 16  ;;  %v386_v45 = vshrl.u32 %v362_v18, 16 }
  0x5f   :  { %v377_v41 = vcvt.s32.f32 %v369_v26  ;;  %v378_v49 = vcvt.s32.f32 %v370_v27  ;;  %v387_v53 = vshrl.u32 %v363_v50, 16  ;;  %v388_v44 = vshrl.u32 %v364_v8, 16 }
  0x60   :  { %v379_v54 = vcvt.s32.f32 %v371_v32  ;;  %v380_v24 = vcvt.s32.f32 %v372_v39  ;;  %v389_v56 = vcvt.s32.f32 %v381_v42  ;;  %v390_v25 = vcvt.s32.f32 %v382_v52 }
  0x61   :  { %v391_v57 = vcvt.s32.f32 %v383_v47  ;;  %v397_v58 = vadd.f32 %v373_v33, %v697_v55  ;;  %v398_v59 = vadd.f32 %v374_v43, %v703_v19  ;;  %v399_v62 = vadd.f32 %v375_v38, %v705_v21 }
  0x62   :  { %v392_v10 = vcvt.s32.f32 %v384_v40  ;;  %v393_v60 = vcvt.s32.f32 %v385_v48  ;;  %v394_v61 = vcvt.s32.f32 %v386_v45  ;;  %v400_v1 = vadd.f32 %v376_v36, %v707_v4 }
  0x63   :  { %v395_v63 = vcvt.s32.f32 %v387_v53  ;;  %v396_v11 = vcvt.s32.f32 %v388_v44  ;;  %v401_v5 = vadd.f32 %v377_v41, %v289_v3  ;;  %v402_v15 = vadd.f32 %v378_v49, %v290_v51 }
  0x64   :  { %v403_v12 = vadd.f32 %v379_v54, %v291_v9  ;;  %v404_v16 = vadd.f32 %v380_v24, %v292_v22  ;;  %v723_v2 = vadd.f32 %v397_v58, %v389_v56  ;;  %v725_v13 = vadd.f32 %v398_v59, %v390_v25 }
  0x65   :  { %v727_v55 = vadd.f32 %v399_v62, %v391_v57  ;;  %v415_v19 = vxor.u32 3266489917, %v607_v28  ;;  %v416_v21 = vxor.u32 3266489917, %v609_v29  ;;  %v417_v17 = vxor.u32 3266489917, %v611_v30 }
  0x66   :  { %v732_v20 = vadd.f32 %v400_v1, %v392_v10  ;;  %v418_v4 = vxor.u32 3266489917, %v613_v31  ;;  %v419_v3 = vxor.u32 3266489917, %v617_v34  ;;  %v420_v14 = vxor.u32 3266489917, %v619_v35 }
  0x67   :  { %v421_v18 = vshrl.u32 %v413_v37, 16  ;;  %v422_v6 = vshrl.u32 %v414_v46, 16  ;;  %v423_v50 = vshrl.u32 %v415_v19, 16  ;;  %v424_v8 = vshrl.u32 %v416_v21, 16 }
  0x68   :  { %v425_v0 = vshrl.u32 %v417_v17, 16  ;;  %v426_v7 = vshrl.u32 %v418_v4, 16  ;;  %v427_v51 = vshrl.u32 %v419_v3, 16  ;;  %v428_v28 = vshrl.u32 %v420_v14, 16 }
  0x69   :  { %v429_v9 = vxor.u32 %v421_v18, %v413_v37  ;;  %v430_v29 = vxor.u32 %v422_v6, %v414_v46  ;;  %v431_v22 = vxor.u32 %v423_v50, %v415_v19  ;;  %v432_v30 = vxor.u32 %v424_v8, %v416_v21 }
  0x6a   :  { %v433_v23 = vxor.u32 %v425_v0, %v417_v17  ;;  %v434_v26 = vxor.u32 %v426_v7, %v418_v4  ;;  %v435_v27 = vxor.u32 %v427_v51, %v419_v3  ;;  %v436_v31 = vxor.u32 %v428_v28, %v420_v14 }
  0x6b   :  { %v737_v32 = vadd.f32 %v401_v5, %v393_v60  ;;  %v739_v34 = vadd.f32 %v402_v15, %v394_v61  ;;  %v437_v35 = vmul.u32 2246822507, %v429_v9  ;;  %v438_v39 = vmul.u32 2246822507, %v430_v29 }
  0x6c   :  { %v741_v42 = vadd.f32 %v403_v12, %v395_v63  ;;  %v743_v52 = vadd.f32 %v404_v16, %v396_v11  ;;  %v439_v33 = vmul.u32 2246822507, %v431_v22  ;;  %v440_v43 = vmul.u32 2246822507, %v432_v30 }
  0x6d   :  { %v441_v37 = vmul.u32 2246822507, %v433_v23  ;;  %v442_v46 = vmul.u32 2246822507, %v434_v26  ;;  %v445_v38 = vshrl.u32 %v437_v35, 13  ;;  %v446_v47 = vshrl.u32 %v438_v39, 13 }
  0x6e   :  { %v443_v36 = vmul.u32 2246822507, %v435_v27  ;;  %v444_v40 = vmul.u32 2246822507, %v436_v31  ;;  %v447_v48 = vshrl.u32 %v439_v33, 13  ;;  %v448_v45 = vshrl.u32 %v440_v43, 13 }
  0x6f   :  { %v449_v41 = vshrl.u32 %v441_v37, 13  ;;  %v450_v49 = vshrl.u32 %v442_v46, 13  ;;  %v453_v53 = vxor.u32 %v445_v38, %v437_v35  ;;  %v454_v44 = vxor.u32 %v446_v47, %v438_v39 }
  0x70   :  { %v451_v54 = vshrl.u32 %v443_v36, 13  ;;  %v452_v24 = vshrl.u32 %v444_v40, 13  ;;  %v455_v56 = vxor.u32 %v447_v48, %v439_v33  ;;  %v456_v25 = vxor.u32 %v448_v45, %v440_v43 }
  0x71   :  { %v457_v57 = vxor.u32 %v449_v41, %v441_v37  ;;  %v458_v58 = vxor.u32 %v450_v49, %v442_v46  ;;  %v461_v59 = vmul.u32 3266489909, %v453_v53  ;;  %v462_v62 = vmul.u32 3266489909, %v454_v44 }
  0x72   :  { %v459_v10 = vxor.u32 %v451_v54, %v443_v36  ;;  %v460_v60 = vxor.u32 %v452_v24, %v444_v40  ;;  %v463_v61 = vmul.u32 3266489909, %v455_v56  ;;  %v464_v1 = vmul.u32 3266489909, %v456_v25 }
  0x73   :  { %v465_v63 = vmul.u32 3266489909, %v457_v57  ;;  %v466_v11 = vmul.u32 3266489909, %v458_v58  ;;  %v469_v5 = vshrl.u32 %v461_v59, 16  ;;  %v470_v15 = vshrl.u32 %v462_v62, 16 }
  0x74   :  { %v467_v12 = vmul.u32 3266489909, %v459_v10  ;;  %v468_v16 = vmul.u32 3266489909, %v460_v60  ;;  %v471_v19 = vshrl.u32 %v463_v61, 16  ;;  %v472_v21 = vshrl.u32 %v464_v1, 16 }
  0x75   :  { %v473_v17 = vshrl.u32 %v465_v63, 16  ;;  %v474_v4 = vshrl.u32 %v466_v11, 16  ;;  %v477_v3 = vxor.u32 %v469_v5, %v461_v59  ;;  %v478_v14 = vxor.u32 %v470_v15, %v462_v62 }
  0x76   :  { %v475_v18 = vshrl.u32 %v467_v12, 16  ;;  %v476_v6 = vshrl.u32 %v468_v16, 16  ;;  %v479_v50 = vxor.u32 %v471_v19, %v463_v61  ;;  %v480_v8 = vxor.u32 %v472_v21, %v464_v1 }
  0x77   :  { %v481_v0 = vxor.u32 %v473_v17, %v465_v63  ;;  %v482_v7 = vxor.u32 %v474_v4, %v466_v11  ;;  %v485_v51 = vand.u32 65535, %v477_v3  ;;  %v486_v28 = vand.u32 65535, %v478_v14 }
  0x78   :  { %v483_v9 = vxor.u32 %v475_v18, %v467_v12  ;;  %v484_v29 = vxor.u32 %v476_v6, %v468_v16  ;;  %v487_v22 = vand.u32 65535, %v479_v50  ;;  %v488_v30 = vand.u32 65535, %v480_v8 }
  0x79   :  { %v489_v23 = vand.u32 65535, %v481_v0  ;;  %v490_v26 = vand.u32 65535, %v482_v7  ;;  %v493_v27 = vcvt.s32.f32 %v485_v51  ;;  %v494_v31 = vcvt.s32.f32 %v486_v28 }
  0x7a   :  { %v491_v35 = vand.u32 65535, %v483_v9  ;;  %v492_v39 = vand.u32 65535, %v484_v29  ;;  %v495_v33 = vcvt.s32.f32 %v487_v22  ;;  %v496_v43 = vcvt.s32.f32 %v488_v30 }
  0x7b   :  { %v497_v37 = vcvt.s32.f32 %v489_v23  ;;  %v498_v46 = vcvt.s32.f32 %v490_v26  ;;  %v501_v38 = vshrl.u32 %v477_v3, 16  ;;  %v502_v47 = vshrl.u32 %v478_v14, 16 }
  0x7c   :  { %v499_v36 = vcvt.s32.f32 %v491_v35  ;;  %v500_v40 = vcvt.s32.f32 %v492_v39  ;;  %v503_v48 = vshrl.u32 %v479_v50, 16  ;;  %v504_v45 = vshrl.u32 %v480_v8, 16  ;;  %v553_v50 = vld [vmem:[%s802_s0 + $0x20] sm:$0xff]  ;;  %v554_v8 = vld [vmem:[%s802_s0 + $0x28] sm:$0xff] }
  0x7d   :  { %v505_v41 = vshrl.u32 %v481_v0, 16  ;;  %v506_v49 = vshrl.u32 %v482_v7, 16  ;;  %v507_v53 = vshrl.u32 %v483_v9, 16  ;;  %v508_v44 = vshrl.u32 %v484_v29, 16  ;;  %v555_v0 = vld [vmem:[%s802_s0 + $0x30] sm:$0xff]  ;;  %v556_v9 = vld [vmem:[%s802_s0 + $0x38] sm:$0xff] }
  0x7e   :  { %v509_v54 = vcvt.s32.f32 %v501_v38  ;;  %v510_v24 = vcvt.s32.f32 %v502_v47  ;;  %v511_v56 = vcvt.s32.f32 %v503_v48  ;;  %v512_v25 = vcvt.s32.f32 %v504_v45 }
  0x7f   :  { %v513_v57 = vcvt.s32.f32 %v505_v41  ;;  %v514_v58 = vcvt.s32.f32 %v506_v49  ;;  %v515_v59 = vcvt.s32.f32 %v507_v53  ;;  %v516_v62 = vcvt.s32.f32 %v508_v44 }
  0x80   :  { %v517_v10 = vadd.f32 %v493_v27, %v723_v2  ;;  %v518_v60 = vadd.f32 %v494_v31, %v725_v13  ;;  %v519_v61 = vadd.f32 %v495_v33, %v727_v55  ;;  %v520_v1 = vadd.f32 %v496_v43, %v732_v20  ;;  %v549_v55 = vld [vmem:[%s802_s0] sm:$0xff] }
  0x81   :  { %v521_v63 = vadd.f32 %v497_v37, %v737_v32  ;;  %v522_v11 = vadd.f32 %v498_v46, %v739_v34  ;;  %v523_v5 = vadd.f32 %v499_v36, %v741_v42  ;;  %v524_v15 = vadd.f32 %v500_v40, %v743_v52  ;;  %v550_v34 = vld [vmem:[%s802_s0 + $0x8] sm:$0xff]  ;;  %v551_v42 = vld [vmem:[%s802_s0 + $0x10] sm:$0xff]  ;;  %v552_v52 = vld [vmem:[%s802_s0 + $0x18] sm:$0xff] }
  0x82   :  { %v525_v12 = vadd.f32 %v517_v10, %v509_v54  ;;  %v526_v16 = vadd.f32 %v518_v60, %v510_v24  ;;  %v527_v19 = vadd.f32 %v519_v61, %v511_v56  ;;  %v528_v21 = vadd.f32 %v520_v1, %v512_v25 }
  0x83   :  { %v529_v17 = vadd.f32 %v521_v63, %v513_v57  ;;  %v530_v2 = vadd.f32 %v522_v11, %v514_v58  ;;  %v531_v4 = vadd.f32 %v523_v5, %v515_v59  ;;  %v532_v13 = vadd.f32 %v524_v15, %v516_v62 }
  0x84   :  { %v577_v20 = vadd.f32 -262140.0, %v525_v12  ;;  %v578_v32 = vadd.f32 -262140.0, %v526_v16  ;;  %v579_v3 = vadd.f32 -262140.0, %v527_v19 }
  0x85   :  { %v580_v14 = vadd.f32 -262140.0, %v528_v21  ;;  %v581_v18 = vadd.f32 -262140.0, %v529_v17  ;;  %v582_v6 = vadd.f32 -262140.0, %v530_v2 }
  0x86   :  { %v583_v7 = vadd.f32 -262140.0, %v531_v4  ;;  %v584_v51 = vadd.f32 -262140.0, %v532_v13  ;;  %v541_v28 = vmul.f32 1.8688123e-06, %v577_v20 }
  0x87   :  { %v542_v29 = vmul.f32 1.8688123e-06, %v578_v32  ;;  %v543_v22 = vmul.f32 1.8688123e-06, %v579_v3  ;;  %v544_v30 = vmul.f32 1.8688123e-06, %v580_v14 }
  0x88   :  { %v545_v23 = vmul.f32 1.8688123e-06, %v581_v18  ;;  %v546_v26 = vmul.f32 1.8688123e-06, %v582_v6  ;;  %v547_v27 = vmul.f32 1.8688123e-06, %v583_v7  ;;  %v557_v31 = vadd.f32 %v549_v55, %v541_v28 }
  0x89   :  { %v548_v35 = vmul.f32 1.8688123e-06, %v584_v51  ;;  %v558_v39 = vadd.f32 %v550_v34, %v542_v29  ;;  %v559_v33 = vadd.f32 %v551_v42, %v543_v22  ;;  %v560_v43 = vadd.f32 %v552_v52, %v544_v30 }
  0x8a   :  { %v561_v37 = vadd.f32 %v553_v50, %v545_v23  ;;  %v562_v46 = vadd.f32 %v554_v8, %v546_v26  ;;  %v563_v38 = vadd.f32 %v555_v0, %v547_v27  ;;  %565 = vst [vmem:[%s803_s2] sm:$0xff] %v557_v31 }
  0x8b   :  { %v564_v47 = vadd.f32 %v556_v9, %v548_v35  ;;  %566 = vst [vmem:[%s803_s2 + $0x8] sm:$0xff] %v558_v39  ;;  %567 = vst [vmem:[%s803_s2 + $0x10] sm:$0xff] %v559_v33 }
  0x8c   :  { %568 = vst [vmem:[%s803_s2 + $0x18] sm:$0xff] %v560_v43  ;;  %569 = vst [vmem:[%s803_s2 + $0x20] sm:$0xff] %v561_v37 }
  0x8d   :  { %570 = vst [vmem:[%s803_s2 + $0x28] sm:$0xff] %v562_v46  ;;  %571 = vst [vmem:[%s803_s2 + $0x30] sm:$0xff] %v563_v38 }
  0x8e   :  { %572 = vst [vmem:[%s803_s2 + $0x38] sm:$0xff] %v564_v47 }

</bundles_post_ra>
